<compile_context>
chip_gen: v7x
topology: tpu7x:2x2x1
jax: 0.10.0
libtpu: 0.0.40
codegen_flags: <defaults>
</compile_context>

<pallas_src>
import functools

import jax
import jax.numpy as jnp
from jax.experimental import pallas as pl
from jax.experimental.pallas import tpu as pltpu


# ----------------------------------------------------------------------------
# Kernel
# ----------------------------------------------------------------------------
def attention_kernel(x_ref, w_ref, o_ref, m_sc, l_sc, acc_sc, *, use_mxu):
    # x_ref: (bt, st, H)  w_ref: (1, H)  o_ref: (bt, H)
    # m_sc/l_sc: (bt, 1) f32   acc_sc: (bt, H) f32
    k = pl.program_id(1)

    @pl.when(k == 0)
    def _():
        m_sc[...] = jnp.full_like(m_sc, -jnp.inf)
        l_sc[...] = jnp.zeros_like(l_sc)
        acc_sc[...] = jnp.zeros_like(acc_sc)

    x = x_ref[...]                                    # (bt, st, H), orig dtype
    wf = w_ref[...].astype(jnp.float32)[None]         # (1, 1, H) f32

    # Energy, lane-dense (bt, st): broadcast mul (promotes to f32 in-flight,
    # no materialized f32 copy of x) + lane reduce.
    energy = jnp.sum(x * wf, axis=-1)                 # (bt, st) f32

    # Online softmax update.
    m_prev = m_sc[...]                                # (bt, 1)
    m_new = jnp.maximum(m_prev, jnp.max(energy, axis=-1, keepdims=True))
    alpha = jnp.exp(m_prev - m_new)                   # (bt, 1)
    p = jnp.exp(energy - m_new)                       # (bt, st) f32, unnormalized

    l_sc[...] = alpha * l_sc[...] + jnp.sum(p, axis=-1, keepdims=True)

    if use_mxu:
        # bf16-native MXU contraction over the seq axis (q = 1), f32 accumulate.
        part = jnp.einsum(
            "bqs,bsh->bqh", p.astype(x.dtype)[:, None, :], x,
            preferred_element_type=jnp.float32)[:, 0, :]        # (bt, H)
    else:
        # VPU/XLU weighted reduction (full f32 precision, no degenerate matmul).
        part = jnp.sum(p[:, :, None] * x, axis=1)               # (bt, H) f32

    acc_sc[...] = alpha * acc_sc[...] + part
    m_sc[...] = m_new

    @pl.when(k == pl.num_programs(1) - 1)
    def _():
        o_ref[...] = (acc_sc[...] *
                      pl.reciprocal(l_sc[...], approx=False)).astype(o_ref.dtype)


# ----------------------------------------------------------------------------
# Tiling / VMEM planning
# ----------------------------------------------------------------------------
def _tpu_budget():
    """Best-effort (vmem_capacity_bytes, num_tensorcores); safe fallbacks."""
    vmem_cap = 64 << 20          # conservative (v7x-sized) default
    num_cores = 1
    try:
        info = pltpu.get_tpu_info()
        cap = getattr(info, "vmem_capacity_bytes", None)
        if isinstance(cap, int) and cap > 0:
            vmem_cap = cap
        for name in ("num_cores", "tensorcore_count", "num_tensorcores",
                     "cores_per_chip", "core_count"):
            v = getattr(info, name, None)
            if isinstance(v, int) and v > 0:
                num_cores = v
                break
    except Exception:
        pass
    return vmem_cap, num_cores


def _plan_tiles(B, S, H, itemsize, vmem_cap, num_cores,
                batch_tile=None, seq_tile=None, block_target=8 << 20):
    usable = (vmem_cap * 3) // 4          # headroom for compiler scratch/out bufs

    def in_block(bt, st):
        return bt * st * H * itemsize

    def footprint(bt, st):
        # double-buffered input block + ~2 f32-promoted temporaries + misc
        return 2 * in_block(bt, st) + 2 * bt * st * H * 4 + (1 << 20)

    # --- sequence tile: full S unless even one batch row blows the budget.
    if seq_tile is not None:
        st = seq_tile
    else:
        st = S
        if footprint(1, S) > usable:
            cands = [d for d in range(8, S + 1, 8)
                     if S % d == 0 and footprint(1, d) <= usable]
            if cands:
                st = max(cands)
            # TODO(synk): if S has no suitable multiple-of-8 divisor we keep
            # st=S; truly huge/ragged S would need an Element/BoundedSlice path.

    # --- batch tile: largest VMEM-feasible divisor of B, preferring
    #     megacore coverage (only when >1 TC), sublane-aligned output blocks,
    #     and input slabs at or under the ~8 MiB block target.
    if batch_tile is not None:
        bt = batch_tile
    else:
        feas = [d for d in range(1, B + 1)
                if B % d == 0 and footprint(d, st) <= usable]
        if not feas:
            feas = [1]
        want_steps = num_cores if (num_cores > 1 and B >= num_cores) else 1

        def score(d):
            megacore_ok = (B // d) >= want_steps
            aligned = (d % 8 == 0) or (d == B)
            fits_target = in_block(d, st) <= block_target
            return (megacore_ok, aligned, fits_target, d)

        bt = max(feas, key=score)

    assert B % bt == 0 and S % st == 0, (B, bt, S, st)
    vmem_limit = int(max(32 << 20, min(vmem_cap, footprint(bt, st) + (16 << 20))))
    return bt, st, vmem_limit


def _prefer_mxu(dtype, bt, st, H):
    """Pick the contraction unit per the shape/dtype regime."""
    if jnp.dtype(dtype) == jnp.float32:
        return False   # keep full f32 precision on the VPU; f32 MXU is multi-pass
    mxu_cycles = bt * (-(-st // 256)) * (-(-H // 256)) * 8   # q=1 matmul cadence
    vpu_cycles = max(1, (bt * st * H) // 2048)               # ~2 ops/elem, 4 VALU
    return mxu_cycles < vpu_cycles


# ----------------------------------------------------------------------------
# Wrapper
# ----------------------------------------------------------------------------
def attention_forward(encoder_outputs, weight, bias=None, *,
                      seq_tile=None, batch_tile=None, use_mxu=None):
    """encoder_outputs: (B, S, H); weight: (1, H) (torch nn.Linear(H,1) layout);
    bias: (1,) — ignored inside the kernel (softmax over S is shift-invariant)."""
    B, S, H = encoder_outputs.shape
    assert weight.shape == (1, H), (
        f"expected torch Linear weight layout (1, {H}), got {weight.shape}")
    del bias  # scalar shift along the softmax axis: mathematically a no-op

    itemsize = jnp.dtype(encoder_outputs.dtype).itemsize
    vmem_cap, num_cores = _tpu_budget()
    bt, st, vmem_limit = _plan_tiles(B, S, H, itemsize, vmem_cap, num_cores,
                                     batch_tile=batch_tile, seq_tile=seq_tile)
    if use_mxu is None:
        use_mxu = _prefer_mxu(encoder_outputs.dtype, bt, st, H)

    kernel = functools.partial(attention_kernel, use_mxu=use_mxu)
    grid = (B // bt, S // st)

    return pl.pallas_call(
        kernel,
        out_shape=jax.ShapeDtypeStruct((B, H), encoder_outputs.dtype),
        grid_spec=pltpu.PrefetchScalarGridSpec(
            num_scalar_prefetch=0,
            grid=grid,
            in_specs=[
                pl.BlockSpec((bt, st, H), lambda i, k: (i, k, 0)),
                pl.BlockSpec((1, H), lambda i, k: (0, 0)),
            ],
            out_specs=pl.BlockSpec((bt, H), lambda i, k: (i, 0)),
            scratch_shapes=[
                pltpu.VMEM((bt, 1), jnp.float32),   # running max m
                pltpu.VMEM((bt, 1), jnp.float32),   # running denom l
                pltpu.VMEM((bt, H), jnp.float32),   # context accumulator
            ],
        ),
        compiler_params=pltpu.CompilerParams(
            dimension_semantics=("parallel", "arbitrary"),
            vmem_limit_bytes=vmem_limit,
        ),
    )(encoder_outputs, weight)


def attention_ref(encoder_outputs, weight, bias):
    # Pure-JAX reference mirroring the PyTorch module (including the bias).
    energy = jnp.einsum("bsh,oh->bso", encoder_outputs, weight) + bias  # (B,S,1)
    attn = jax.nn.softmax(energy, axis=1)
    return jnp.sum(attn * encoder_outputs, axis=1)                      # (B,H)


if __name__ == "__main__":
    key = jax.random.PRNGKey(0)
    k_x, k_w, k_b = jax.random.split(key, 3)

    # --- Test A: module-scale shapes, single-block fast path (f32, VPU ctx).
    B, S, H = 2, 8, 32
    x = jax.random.normal(k_x, (B, S, H), dtype=jnp.float32)
    bound = 1.0 / (H ** 0.5)
    w = jax.random.uniform(k_w, (1, H), jnp.float32, -bound, bound)
    b = jax.random.uniform(k_b, (1,), jnp.float32, -bound, bound)

    out = jax.block_until_ready(attention_forward(x, w, b))
    ref = attention_ref(x, w, b)
    assert out.shape == (B, H)
    assert jnp.allclose(out, ref, atol=1e-5, rtol=1e-5), float(
        jnp.max(jnp.abs(out - ref)))

    # --- Test B: S-tiled online-softmax path (f32, VPU contraction).
    B2, S2, H2 = 8, 64, 128
    bound2 = 1.0 / (H2 ** 0.5)
    x2 = jax.random.normal(k_x, (B2, S2, H2), dtype=jnp.float32)
    w2 = jax.random.uniform(k_w, (1, H2), jnp.float32, -bound2, bound2)

    out2 = jax.block_until_ready(attention_forward(x2, w2, b, seq_tile=16))
    ref2 = attention_ref(x2, w2, b)
    assert jnp.allclose(out2, ref2, atol=1e-5, rtol=1e-4), float(
        jnp.max(jnp.abs(out2 - ref2)))

    # --- Test C: bf16 inputs, S-tiled + MXU contraction path.
    x3 = x2.astype(jnp.bfloat16)
    w3 = w2.astype(jnp.bfloat16)
    out3 = jax.block_until_ready(
        attention_forward(x3, w3, b, seq_tile=16, use_mxu=True))
    ref3 = attention_ref(x3.astype(jnp.float32), w3.astype(jnp.float32), b)
    err3 = jnp.max(jnp.abs(out3.astype(jnp.float32) - ref3))
    assert jnp.allclose(out3.astype(jnp.float32), ref3, atol=2e-2, rtol=2e-2), float(err3)

    print("KERNEL_OK")
</pallas_src>

<mosaic_0001>
module attributes {stable_mosaic.version = 11 : i64} {
  func.func @attention_kernel(%arg0: i32, %arg1: i32, %arg2: memref<2x8x32xf32, #tpu.memory_space<vmem>>, %arg3: memref<1x32xf32, #tpu.memory_space<vmem>>, %arg4: memref<2x32xf32, #tpu.memory_space<vmem>>, %arg5: memref<2x1xf32, #tpu.memory_space<vmem>>, %arg6: memref<2x1xf32, #tpu.memory_space<vmem>>, %arg7: memref<2x32xf32, #tpu.memory_space<vmem>>) attributes {dimension_semantics = [#tpu.dimension_semantics<parallel>, #tpu.dimension_semantics<arbitrary>], iteration_bounds = array<i64: 1, 1>, scalar_prefetch = 0 : i64, scratch_operands = 3 : i64, tpu.core_type = #tpu.core_type<tc>, window_params = [{transform_indices = @transform_0, window_bounds = array<i64: 2, 8, 32>}, {pipeline_mode = #tpu.pipeline_mode<synchronous>, transform_indices = @transform_1, window_bounds = array<i64: 1, 32>}, {transform_indices = @transform_2, window_bounds = array<i64: 2, 32>}]} {
    %c0_i32 = arith.constant 0 : i32
    %0 = arith.cmpi eq, %arg1, %c0_i32 : i32
    %1 = arith.extui %0 : i1 to i32
    %c0_i32_0 = arith.constant 0 : i32
    %2 = arith.cmpi ne, %1, %c0_i32_0 : i32
    scf.if %2 {
      %cst_22 = arith.constant 0xFF800000 : f32
      %37 = vector.broadcast %cst_22 : f32 to vector<2x1xf32>
      %c0_23 = arith.constant 0 : index
      %c0_24 = arith.constant 0 : index
      %38 = vector.load %arg5[%c0_23, %c0_24] : memref<2x1xf32, #tpu.memory_space<vmem>>, vector<2x1xf32>
      tpu.vector_store %arg5[%c0_23, %c0_24], %37 {strides = array<i32>} : memref<2x1xf32, #tpu.memory_space<vmem>>, vector<2x1xf32>,
      %cst_25 = arith.constant 0.000000e+00 : f32
      %39 = vector.broadcast %cst_25 : f32 to vector<2x1xf32>
      %c0_26 = arith.constant 0 : index
      %c0_27 = arith.constant 0 : index
      %40 = vector.load %arg6[%c0_26, %c0_27] : memref<2x1xf32, #tpu.memory_space<vmem>>, vector<2x1xf32>
      tpu.vector_store %arg6[%c0_26, %c0_27], %39 {strides = array<i32>} : memref<2x1xf32, #tpu.memory_space<vmem>>, vector<2x1xf32>,
      %cst_28 = arith.constant 0.000000e+00 : f32
      %41 = vector.broadcast %cst_28 : f32 to vector<2x32xf32>
      %c0_29 = arith.constant 0 : index
      %c0_30 = arith.constant 0 : index
      %42 = vector.load %arg7[%c0_29, %c0_30] : memref<2x32xf32, #tpu.memory_space<vmem>>, vector<2x32xf32>
      tpu.vector_store %arg7[%c0_29, %c0_30], %41 {strides = array<i32>} : memref<2x32xf32, #tpu.memory_space<vmem>>, vector<2x32xf32>,
    } else {
    }
    %c0 = arith.constant 0 : index
    %c0_1 = arith.constant 0 : index
    %c0_2 = arith.constant 0 : index
    %3 = vector.load %arg2[%c0, %c0_1, %c0_2] : memref<2x8x32xf32, #tpu.memory_space<vmem>>, vector<2x8x32xf32>
    %c0_3 = arith.constant 0 : index
    %c0_4 = arith.constant 0 : index
    %4 = vector.load %arg3[%c0_3, %c0_4] : memref<1x32xf32, #tpu.memory_space<vmem>>, vector<1x32xf32>
    %5 = vector.shape_cast %4 : vector<1x32xf32> to vector<1x1x32xf32>
    %6 = vector.broadcast %5 : vector<1x1x32xf32> to vector<2x8x32xf32>
    %7 = arith.mulf %3, %6 : vector<2x8x32xf32>
    %cst = arith.constant dense<0.000000e+00> : vector<2x8xf32>
    %8 = vector.multi_reduction <add>, %7, %cst [2] : vector<2x8x32xf32> to vector<2x8xf32>
    %c0_5 = arith.constant 0 : index
    %c0_6 = arith.constant 0 : index
    %9 = vector.load %arg5[%c0_5, %c0_6] : memref<2x1xf32, #tpu.memory_space<vmem>>, vector<2x1xf32>
    %cst_7 = arith.constant dense<0xFF800000> : vector<2xf32>
    %10 = vector.multi_reduction <maximumf>, %8, %cst_7 [1] : vector<2x8xf32> to vector<2xf32>
    %11 = vector.shape_cast %10 : vector<2xf32> to vector<2x1xf32>
    %12 = arith.maximumf %9, %11 : vector<2x1xf32>
    %13 = arith.subf %9, %12 : vector<2x1xf32>
    %14 = math.exp %13 : vector<2x1xf32>
    %15 = vector.broadcast %12 : vector<2x1xf32> to vector<2x8xf32>
    %16 = arith.subf %8, %15 : vector<2x8xf32>
    %17 = math.exp %16 : vector<2x8xf32>
    %c0_8 = arith.constant 0 : index
    %c0_9 = arith.constant 0 : index
    %18 = vector.load %arg6[%c0_8, %c0_9] : memref<2x1xf32, #tpu.memory_space<vmem>>, vector<2x1xf32>
    %19 = arith.mulf %14, %18 : vector<2x1xf32>
    %cst_10 = arith.constant dense<0.000000e+00> : vector<2xf32>
    %20 = vector.multi_reduction <add>, %17, %cst_10 [1] : vector<2x8xf32> to vector<2xf32>
    %21 = vector.shape_cast %20 : vector<2xf32> to vector<2x1xf32>
    %22 = arith.addf %19, %21 : vector<2x1xf32>
    %c0_11 = arith.constant 0 : index
    %c0_12 = arith.constant 0 : index
    %23 = vector.load %arg6[%c0_11, %c0_12] : memref<2x1xf32, #tpu.memory_space<vmem>>, vector<2x1xf32>
    tpu.vector_store %arg6[%c0_11, %c0_12], %22 {strides = array<i32>} : memref<2x1xf32, #tpu.memory_space<vmem>>, vector<2x1xf32>,
    %24 = vector.shape_cast %17 : vector<2x8xf32> to vector<2x8x1xf32>
    %25 = vector.broadcast %24 : vector<2x8x1xf32> to vector<2x8x32xf32>
    %26 = arith.mulf %25, %3 : vector<2x8x32xf32>
    %cst_13 = arith.constant dense<0.000000e+00> : vector<2x32xf32>
    %27 = vector.multi_reduction <add>, %26, %cst_13 [1] : vector<2x8x32xf32> to vector<2x32xf32>
    %c0_14 = arith.constant 0 : index
    %c0_15 = arith.constant 0 : index
    %28 = vector.load %arg7[%c0_14, %c0_15] : memref<2x32xf32, #tpu.memory_space<vmem>>, vector<2x32xf32>
    %29 = vector.broadcast %14 : vector<2x1xf32> to vector<2x32xf32>
    %30 = arith.mulf %29, %28 : vector<2x32xf32>
    %31 = arith.addf %30, %27 : vector<2x32xf32>
    %c0_16 = arith.constant 0 : index
    %c0_17 = arith.constant 0 : index
    %32 = vector.load %arg7[%c0_16, %c0_17] : memref<2x32xf32, #tpu.memory_space<vmem>>, vector<2x32xf32>
    tpu.vector_store %arg7[%c0_16, %c0_17], %31 {strides = array<i32>} : memref<2x32xf32, #tpu.memory_space<vmem>>, vector<2x32xf32>,
    %c0_18 = arith.constant 0 : index
    %c0_19 = arith.constant 0 : index
    %33 = vector.load %arg5[%c0_18, %c0_19] : memref<2x1xf32, #tpu.memory_space<vmem>>, vector<2x1xf32>
    tpu.vector_store %arg5[%c0_18, %c0_19], %12 {strides = array<i32>} : memref<2x1xf32, #tpu.memory_space<vmem>>, vector<2x1xf32>,
    %c0_i32_20 = arith.constant 0 : i32
    %34 = arith.cmpi eq, %arg1, %c0_i32_20 : i32
    %35 = arith.extui %34 : i1 to i32
    %c0_i32_21 = arith.constant 0 : i32
    %36 = arith.cmpi ne, %35, %c0_i32_21 : i32
    scf.if %36 {
      %c0_22 = arith.constant 0 : index
      %c0_23 = arith.constant 0 : index
      %37 = vector.load %arg7[%c0_22, %c0_23] : memref<2x32xf32, #tpu.memory_space<vmem>>, vector<2x32xf32>
      %c0_24 = arith.constant 0 : index
      %c0_25 = arith.constant 0 : index
      %38 = vector.load %arg6[%c0_24, %c0_25] : memref<2x1xf32, #tpu.memory_space<vmem>>, vector<2x1xf32>
      %39 = tpu.reciprocal %38 : vector<2x1xf32> -> vector<2x1xf32>
      %40 = vector.broadcast %39 : vector<2x1xf32> to vector<2x32xf32>
      %41 = arith.mulf %37, %40 : vector<2x32xf32>
      %c0_26 = arith.constant 0 : index
      %c0_27 = arith.constant 0 : index
      %42 = vector.load %arg4[%c0_26, %c0_27] : memref<2x32xf32, #tpu.memory_space<vmem>>, vector<2x32xf32>
      tpu.vector_store %arg4[%c0_26, %c0_27], %41 {strides = array<i32>} : memref<2x32xf32, #tpu.memory_space<vmem>>, vector<2x32xf32>,
    } else {
    }
    return
  }
  func.func @transform_0(%arg0: i32, %arg1: i32) -> (i32, i32, i32) {
    %c0_i32 = arith.constant 0 : i32
    %c0_i32_0 = arith.constant 0 : i32
    return %arg0, %arg1, %c0_i32 : i32, i32, i32
  }
  func.func @transform_1(%arg0: i32, %arg1: i32) -> (i32, i32) {
    %c0_i32 = arith.constant 0 : i32
    %c0_i32_0 = arith.constant 0 : i32
    %c0_i32_1 = arith.constant 0 : i32
    return %c0_i32, %c0_i32_0 : i32, i32
  }
  func.func @transform_2(%arg0: i32, %arg1: i32) -> (i32, i32) {
    %c0_i32 = arith.constant 0 : i32
    %c0_i32_0 = arith.constant 0 : i32
    return %arg0, %c0_i32 : i32, i32
  }
}

</mosaic_0001>

<bundles_post_ra>
// kernel: tpu_custom_call.1
= control target key start
LH: loop header
LB: loop body
LE: loop exit
PB: predicated region body
PF: predicated region fallthrough
CT: control target
= control target key end

     0   :  { %7 = vsyncpa [#allocation6], 0  ;;  %s315_s0 = inlined_call_operand.hbm [shape: f32[2,8,32], index: 0, kind: input, shape index: {}]   ;;  %s316_s1 = inlined_call_operand.vmem [shape: f32[1,32], index: 1, kind: input, shape index: {}]   ;;  %s317_s2 = inlined_call_operand.hbm [shape: f32[2,32], index: 2, kind: output, shape index: {}]  }
   0x1   :  { %8 = vsyncpa [#allocation7], 0  ;;  %s250_s9 = smov [#allocation5]   ;;  %s202_s13 = scalar_lea.hbm %s315_s0, 256 }
   0x2   :  { %s14_s10 = sshll.u32 %s250_s9, 4  ;;  %p203_p0 = scmp.ne.s32.totalorder %s315_s0, %s202_s13  ;;  %s15_s10 = int_to_ptr.vmem [resolvable:$true] %s14_s10 }
   0x3   :  { %p206_p1 = scmp.lt.u32.totalorder %s202_s13, %s315_s0 }
   0x5   :  { %p208_p2 = pnand %p206_p1, %p203_p0 }
   0x7   :  { %211 = shalt.err (!%p208_p2)
}
   0x8   :  { %s212_s18 = scalar_lea.vmem %s15_s10, 256  ;;  %p217_p4 = scmp.lt.s32.totalorder %s15_s10, %s15_s10 }
   0x9   :  { %p213_p3 = scmp.ne.s32.totalorder %s15_s10, %s212_s18  ;;  %p218_p5 = scmp.lt.s32.totalorder %s212_s18, %s212_s18 }
   0xb   :  { %p219_p6 = por %p218_p5, %p217_p4 }
   0xd   :  { %p220_p7 = pnand %p219_p6, %p213_p3 }
   0xf   :  { %223 = shalt.err (!%p220_p7)
}
  0x10   :  { %s251_s19 = smov 128   ;;  %s252_s20 = smov 8  }
  0x11   :  { %20 = dma.hbm_to_vmem [thread:$0]  %s315_s0, 256, %s15_s10, [#allocation6], %s251_s19, %s251_s19, %s252_s20  }
  0x12   :  { %246 = dma.done.wait [#allocation6], 256  }
  0x13   :  { %247 = vsyncadd [#allocation6], 4294967040  ;;  %v35_v0 = vld [vmem:[#allocation5] sm:$0xff]  ;;  %v184_v1 = vld [vmem:[%s316_s1] ss:$0 sm:$0xff]  ;;  %vm46_vm0 = vcmask 261120   ;;  %v56_v8 = vlaneseq }
  0x14   :  { %v36_v2 = vld [vmem:[#allocation5 + $0x8] sm:$0xff]  ;;  %v44_v3 = vmul.f32 %v184_v1, %v35_v0  ;;  %vm30_vm1 = vcmask 1024   ;;  %v253_v7 = vmov -inf   ;;  %vm66_vm2 = vcmask 1041409   ;;  %s256_s0 = smov [#allocation8]  }
  0x15   :  { %v45_v4 = vmul.f32 %v184_v1, %v36_v2  ;;  %31 = vst.msk [vmem:[#allocation2] sm:$0x3] %vm30_vm1, %v253_v7  ;;  %v57_v9 = vand.u32 127, %v56_v8  ;;  %v59_v10 = vshrl.u32 %v56_v8, 7  ;;  %vm69_vm3 = vcmask 58368   ;;  %s175_s1 = sshll.u32 %s256_s0, 4  ;;  %s176_s1 = int_to_ptr.vmem [resolvable:$true] %s175_s1 }
  0x16   :  { %v47_v5 = vsel %vm46_vm0, %v44_v3, 0.0  ;;  %v254_v18 = vmov 0   ;;  %v255_v19 = vmov 0.0   ;;  %vm33_vm4 = vcmask 254976   ;;  %s224_s25 = scalar_lea.vmem %s176_s1, 32  ;;  %p229_p9 = scmp.lt.s32.totalorder %s176_s1, %s176_s1 }
  0x17   :  { %48 = vadd.xlane.f32.xlu0 %v47_v5  ;;  %v50_v6 = vsel %vm46_vm0, %v45_v4, 0.0  ;;  %v60_v12 = vsub.s32 %v57_v9, %v59_v10  ;;  %192 = vset.pattern.permute.xlu1 %v254_v18  ;;  %32 = vst.msk [vmem:[#allocation3] sm:$0x3] %vm30_vm1, %v255_v19  ;;  %v83_v24 = vsub.s32 0, %v59_v10  ;;  %v87_v25 = vsub.s32 1, %v59_v10  ;;  %p225_p8 = scmp.ne.s32.totalorder %s176_s1, %s224_s25  ;;  %p230_p10 = scmp.lt.s32.totalorder %s224_s25, %s224_s25 }
  0x18   :  { %193 = vset.pattern.permute.xlu0 %v254_v18  ;;  %34 = vst.msk [vmem:[#allocation4] sm:$0x3] %vm33_vm4, %v255_v19 }
  0x19   :  { %p231_p11 = por %p230_p10, %p229_p9 }
  0x1b   :  { %51 = vadd.xlane.f32.xlu0 %v50_v6  ;;  %p232_p12 = pnand %p231_p11, %p225_p8 }
  0x1c   :  { %v53_v20 = vld [vmem:[#allocation2] sm:$0x3] }
  0x1f   :  { %v141_v57 = vld [vmem:[#allocation4] sm:$0x3] }
  0xa4   :  { %v49_v11 = vpop.xlane.xlu0 %48 }
  0xa5   :  { %v61_v14 = vrot.slane %v49_v11, %v60_v12 }
  0xa8   :  { %v52_v13 = vpop.xlane.xlu0 %51 }
  0xa9   :  { %v65_v15 = vrot.slane %v52_v13, %v60_v12 }
  0xab   :  { %v67_v16 = vsel %vm66_vm2, %v65_v15, %v61_v14 }
  0xac   :  { %v70_v17 = vsel %vm69_vm3, %v67_v16, -inf }
  0xad   :  { %71 = vmax.xlane.f32.xlu1 %v70_v17 }
 0x13a   :  { %v72_v21 = vpop.xlane.xlu1 %71 }
 0x13b   :  { %v73_v22 = vmax.f32 %v53_v20, %v72_v21 }
 0x13d   :  { %v74_v23 = vsub.f32 %v53_v20, %v73_v22  ;;  %155 = vst.msk [vmem:[#allocation2] sm:$0x3] %vm30_vm1, %v73_v22  ;;  %79 = vperm.xlu1 %192, %v73_v22  }
 0x13f   :  { %v75_v33 = vmul.f32 1.442695, %v74_v23 }
 0x1bc   :  { %v80_v26 = vpop.permute.xlu1 %79 }
 0x1bd   :  { %v84_v27 = vrot.slane %v80_v26, %v83_v24  ;;  %v88_v28 = vrot.slane %v80_v26, %v87_v25 }
 0x1bf   :  { %v91_v29 = vsub.f32 %v49_v11, %v84_v27  ;;  %v92_v30 = vsub.f32 %v52_v13, %v88_v28 }
 0x1c1   :  { %v93_v31 = vmul.f32 1.442695, %v91_v29  ;;  %v95_v32 = vmul.f32 1.442695, %v92_v30 }
 0x1c3   :  { %194 = vpow2.f32 %v93_v31 }
 0x1c4   :  { %196 = vpow2.f32 %v95_v32 }
 0x1c5   :  { %198 = vpow2.f32 %v75_v33 }
 0x1cd   :  { %v195_v34 = vpop.eup %194 }
 0x1ce   :  { %v197_v35 = vpop.eup %196  ;;  %102 = vperm.xlu0 %193, %v195_v34  }
 0x1cf   :  { %105 = vperm.xlu1 %192, %v197_v35   ;;  %v199_v36 = vpop.eup %198 }
 0x1d2   :  { %144 = vperm.xlu0 %193, %v199_v36  }
 0x24d   :  { %v103_v37 = vpop.permute.xlu0 %102 }
 0x24e   :  { %v106_v38 = vpop.permute.xlu1 %105  ;;  %v110_v39 = vrot.slane %v103_v37, %v60_v12  ;;  %v125_v40 = vmul.f32 %v103_v37, %v35_v0  ;;  %v97_v0 = vld [vmem:[#allocation3] sm:$0x3] }
 0x24f   :  { %v114_v41 = vrot.slane %v106_v38, %v60_v12  ;;  %v126_v42 = vmul.f32 %v106_v38, %v36_v2  ;;  %v98_v1 = vmul.f32 %v199_v36, %v97_v0 }
 0x250   :  { %v127_v43 = vsel %vm46_vm0, %v125_v40, 0.0 }
 0x251   :  { %v134_v44 = vsel %vm46_vm0, %v126_v42, 0.0  ;;  %v128_v45 = vrot.slane %v127_v43, 4  ;;  %v115_v46 = vsel %vm66_vm2, %v114_v41, %v110_v39  ;;  %v145_v58 = vpop.permute.xlu0 %144 }
 0x252   :  { %v135_v47 = vrot.slane %v134_v44, 4  ;;  %v117_v48 = vsel %vm69_vm3, %v115_v46, 0.0  ;;  %v147_v61 = vmul.f32 %v145_v58, %v141_v57 }
 0x253   :  { %v129_v49 = vadd.f32 %v128_v45, %v127_v43  ;;  %118 = vadd.xlane.f32.xlu1 %v117_v48 }
 0x254   :  { %v136_v50 = vadd.f32 %v135_v47, %v134_v44 }
 0x255   :  { %v130_v51 = vrot.slane %v129_v49, 2 }
 0x256   :  { %v137_v52 = vrot.slane %v136_v50, 2 }
 0x257   :  { %v131_v53 = vadd.f32 %v130_v51, %v129_v49 }
 0x258   :  { %v138_v54 = vadd.f32 %v137_v52, %v136_v50 }
 0x259   :  { %v132_v55 = vrot.slane %v131_v53, 1 }
 0x25a   :  { %v139_v56 = vrot.slane %v138_v54, 1 }
 0x25b   :  { %v133_v59 = vadd.f32 %v132_v55, %v131_v53 }
 0x25c   :  { %v140_v60 = vadd.f32 %v139_v56, %v138_v54 }
 0x25e   :  { %v150_v62 = vsel %vm66_vm2, %v140_v60, %v133_v59 }
 0x25f   :  { %v152_v63 = vadd.f32 %v150_v62, %v147_v61 }
 0x261   :  { %154 = vst.msk [vmem:[#allocation4] sm:$0x3] %vm33_vm4, %v152_v63 }
 0x268   :  { %v159_v6 = vld [vmem:[#allocation4] sm:$0x3] }
 0x2e0   :  { %v119_v2 = vpop.xlane.xlu1 %118 }
 0x2e1   :  { %v120_v3 = vadd.f32 %v119_v2, %v98_v1 }
 0x2e3   :  { %122 = vst.msk [vmem:[#allocation3] sm:$0x3] %vm30_vm1, %v120_v3 }
 0x2ea   :  { %v160_v4 = vld [vmem:[#allocation3] sm:$0x3] }
 0x2eb   :  { %200 = vrcp.f32 %v160_v4 }
 0x2f5   :  { %v201_v5 = vpop.eup %200 }
 0x2f6   :  { %164 = vperm.xlu0 %193, %v201_v5  }
 0x375   :  { %v165_v7 = vpop.permute.xlu0 %164 }
 0x376   :  { %v167_v8 = vmul.f32 %v165_v7, %v159_v6 }
 0x378   :  { %168 = vst.msk [vmem:[#allocation8] sm:$0x3] %vm33_vm4, %v167_v8 }
 0x379   :  { %235 = shalt.err (!%p232_p12)
}
 0x37a   :  { %s236_s28 = scalar_lea.hbm %s317_s2, 32 }
 0x37b   :  { %p237_p13 = scmp.ne.s32.totalorder %s317_s2, %s236_s28  ;;  %p240_p0 = scmp.lt.u32.totalorder %s236_s28, %s317_s2 }
 0x37d   :  { %p242_p1 = pnand %p240_p0, %p237_p13 }
 0x37f   :  { %245 = shalt.err (!%p242_p1)
}
 0x380   :  { %178 = dma.vmem_to_hbm [thread:$0]  %s176_s1, 32, %s317_s2, [#allocation7]  }
 0x381   :  { %248 = dma.done.wait [#allocation7], 32  }
 0x382   :  { %249 = vsyncadd [#allocation7], 4294967264 }
 0x383   :  { %182 = vsyncpa [#allocation6], 1 }
 0x384   :  { %183 = vsyncpa [#allocation7], 1 }

</bundles_post_ra>
